<compile_context>
chip_gen: v5e
topology: v5e:2x2
jax: 0.10.0
libtpu: 0.0.40
codegen_flags: <defaults>
</compile_context>

<pallas_src>
import functools

import jax
import jax.numpy as jnp
from jax.experimental import pallas as pl
from jax.experimental.pallas import tpu as pltpu


def _round_up(n, m):
    return ((n + m - 1) // m) * m


def _choose_batch_tile(B, *, max_tile=1024, min_tile=256, target_steps=8):
    """Batch tile: >=min_tile rows when B allows (HBM-roofline regime measured
    at 256-512 row tiles); otherwise aim for ~target_steps grid steps so the
    activation/output DMAs pipeline and both v7x TensorCores are engaged."""
    per_step = _round_up(pl.cdiv(B, target_steps), 16)
    tb = max(min_tile, per_step)
    tb = min(tb, max_tile, _round_up(B, 16))
    return max(tb, 16)


# --------------------------------------------------------------------------
# Kernel
# --------------------------------------------------------------------------
def mlp_dual_kernel(x_ref, w1_ref, b1_ref, w2_ref, b2_ref,
                    w4_ref, b4_ref, w5_ref, b5_ref,
                    w3a_ref, w3b_ref, b3_ref, out_ref, *,
                    split, compute_dtype):
    # x_ref: (TB, D) native dtype; weights bf16 (lane-padded); biases (1,N) f32.
    D = x_ref.shape[1]
    att = x_ref[:, pl.ds(0, split)].astype(compute_dtype)
    mlp = x_ref[:, pl.ds(split, D - split)].astype(compute_dtype)

    # Branch A: fc1 -> relu -> fc2 -> relu
    a = jnp.dot(att, w1_ref[...], preferred_element_type=jnp.float32)
    a = jnp.maximum(a + b1_ref[...], 0.0)
    a = jnp.dot(a.astype(compute_dtype), w2_ref[...],
                preferred_element_type=jnp.float32)
    a = jnp.maximum(a + b2_ref[...], 0.0)

    # Branch B: fc4 -> relu -> fc5 -> relu
    b = jnp.dot(mlp, w4_ref[...], preferred_element_type=jnp.float32)
    b = jnp.maximum(b + b4_ref[...], 0.0)
    b = jnp.dot(b.astype(compute_dtype), w5_ref[...],
                preferred_element_type=jnp.float32)
    b = jnp.maximum(b + b5_ref[...], 0.0)

    # fc3 on concat(a, b) == a @ w3[:H] + b @ w3[H:]  (single f32 accumulator)
    o = jnp.dot(a.astype(compute_dtype), w3a_ref[...],
                preferred_element_type=jnp.float32)
    o = o + jnp.dot(b.astype(compute_dtype), w3b_ref[...],
                    preferred_element_type=jnp.float32)
    out_ref[...] = (o + b3_ref[...]).astype(out_ref.dtype)


# --------------------------------------------------------------------------
# Parameter preparation (done once, outside the hot path)
# --------------------------------------------------------------------------
def prepare_params(params, input_dim, output_dim, hidden_dim,
                   compute_dtype=jnp.bfloat16, lane_align=256):
    """Pad the hidden lane dim to a multiple of `lane_align` and pre-cast
    weights to the MXU compute dtype.  Padded weight rows / bias entries are
    zero, so padded hidden columns stay exactly 0 through the ReLU chain."""
    (w1, b1, w2, b2, w3, b3, w4, b4, w5, b5) = params
    d0, d1 = input_dim
    H = hidden_dim
    Hp = _round_up(H, lane_align)

    def pad_w(w, rows, cols):
        out = jnp.zeros((rows, cols), jnp.float32)
        out = out.at[:w.shape[0], :w.shape[1]].set(w)
        return out.astype(compute_dtype)

    def pad_b(b, cols):
        out = jnp.zeros((1, cols), jnp.float32)
        return out.at[:, :b.shape[0]].set(b.reshape(1, -1))

    w1p = pad_w(w1, d0, Hp)
    w4p = pad_w(w4, d1, Hp)
    w2p = pad_w(w2, Hp, Hp)
    w5p = pad_w(w5, Hp, Hp)
    # fc3 split by hidden half: columns kept at the real output_dim (no
    # 128-lane output slab -> no write amplification for small output_dim).
    w3a = pad_w(w3[:H], Hp, output_dim)
    w3b = pad_w(w3[H:], Hp, output_dim)

    b1p = pad_b(b1, Hp)
    b2p = pad_b(b2, Hp)
    b4p = pad_b(b4, Hp)
    b5p = pad_b(b5, Hp)
    b3p = b3.reshape(1, -1).astype(jnp.float32)

    return (w1p, b1p, w2p, b2p, w4p, b4p, w5p, b5p, w3a, w3b, b3p)


# --------------------------------------------------------------------------
# Wrapper
# --------------------------------------------------------------------------
def mlp_dual_forward(x, prepared, split_position, output_dim, *,
                     batch_tile=1024, compute_dtype=jnp.bfloat16):
    """x: (B, ...) -> flattened to (B, D); returns (B, output_dim) f32."""
    (w1p, b1p, w2p, b2p, w4p, b4p, w5p, b5p, w3a, w3b, b3p) = prepared
    B = x.shape[0]
    x = x.reshape(B, -1)
    D = x.shape[1]
    assert split_position == w1p.shape[0] and D - split_position == w4p.shape[0]

    TB = _choose_batch_tile(B, max_tile=batch_tile)
    Bp = _round_up(B, TB)
    if Bp != B:
        x = jnp.pad(x, ((0, Bp - B), (0, 0)))   # only when needed; no dtype cast

    grid = (Bp // TB,)

    def resident(arr):  # constant block index -> fetched once, VMEM-resident
        return pl.BlockSpec(arr.shape, lambda i: (0, 0))

    kernel = functools.partial(mlp_dual_kernel, split=split_position,
                               compute_dtype=compute_dtype)

    out = pl.pallas_call(
        kernel,
        out_shape=jax.ShapeDtypeStruct((Bp, output_dim), jnp.float32),
        grid=grid,
        in_specs=[
            pl.BlockSpec((TB, D), lambda i: (i, 0)),    # activations, batch-tiled
            resident(w1p), resident(b1p),
            resident(w2p), resident(b2p),
            resident(w4p), resident(b4p),
            resident(w5p), resident(b5p),
            resident(w3a), resident(w3b), resident(b3p),
        ],
        out_specs=pl.BlockSpec((TB, output_dim), lambda i: (i, 0)),
        compiler_params=pltpu.CompilerParams(
            dimension_semantics=("parallel",),          # both TCs on v7x
            vmem_limit_bytes=64 * 1024 * 1024,          # headroom; working set is small
        ),
    )(x, w1p, b1p, w2p, b2p, w4p, b4p, w5p, b5p, w3a, w3b, b3p)

    return out[:B] if Bp != B else out


# --------------------------------------------------------------------------
# Params / reference
# --------------------------------------------------------------------------
def init_params(key, input_dim, output_dim, hidden_dim):
    """Deterministic init; weights stored as (in, out), biases 1-D."""
    d0, d1 = input_dim
    shapes = [
        (d0, hidden_dim), (hidden_dim,),                # fc1
        (hidden_dim, hidden_dim), (hidden_dim,),        # fc2
        (2 * hidden_dim, output_dim), (output_dim,),    # fc3
        (d1, hidden_dim), (hidden_dim,),                # fc4
        (hidden_dim, hidden_dim), (hidden_dim,),        # fc5
        # fc6 is defined in __init__ but never used in forward(); omitted.
    ]
    keys = jax.random.split(key, len(shapes))
    params = []
    for k, s in zip(keys, shapes):
        bound = 1.0 / jnp.sqrt(jnp.float32(s[0]))
        params.append(jax.random.uniform(k, s, jnp.float32, -bound, bound))
    return tuple(params)


def reference_forward(x, params, split_position):
    (w1, b1, w2, b2, w3, b3, w4, b4, w5, b5) = params
    x = x.reshape(x.shape[0], -1).astype(jnp.float32)
    att, mlp = x[:, :split_position], x[:, split_position:]
    a = jax.nn.relu(att @ w1 + b1)
    a = jax.nn.relu(a @ w2 + b2)
    b = jax.nn.relu(mlp @ w4 + b4)
    b = jax.nn.relu(b @ w5 + b5)
    return jnp.concatenate([a, b], axis=-1) @ w3 + b3


# --------------------------------------------------------------------------
# Demo / self-check
# --------------------------------------------------------------------------
if __name__ == "__main__":
    key = jax.random.PRNGKey(0)
    k_param, k_x = jax.random.split(key)

    input_dim = (16, 24)       # (att_dim, mlp_dim)
    output_dim = 8
    hidden_dim = 32
    batch = 8

    params = init_params(k_param, input_dim, output_dim, hidden_dim)
    prepared = prepare_params(params, input_dim, output_dim, hidden_dim)
    x = jax.random.normal(k_x, (batch, input_dim[0] + input_dim[1]), jnp.float32)

    fwd = jax.jit(functools.partial(mlp_dual_forward,
                                    split_position=input_dim[0],
                                    output_dim=output_dim))
    out = jax.block_until_ready(fwd(x, prepared))

    ref = reference_forward(x, params, split_position=input_dim[0])
    assert out.shape == (batch, output_dim), out.shape
    # bf16 MXU operands with f32 accumulation -> relaxed tolerance vs f32 ref.
    max_err = float(jnp.max(jnp.abs(out - ref)))
    assert jnp.allclose(out, ref, atol=3e-2, rtol=3e-2), max_err

    print("KERNEL_OK")
</pallas_src>

<mosaic_0001>
module attributes {stable_mosaic.version = 11 : i64} {
  func.func @mlp_dual_kernel(%arg0: i32, %arg1: memref<16x40xf32, #tpu.memory_space<vmem>>, %arg2: memref<16x256xbf16, #tpu.memory_space<vmem>>, %arg3: memref<1x256xf32, #tpu.memory_space<vmem>>, %arg4: memref<256x256xbf16, #tpu.memory_space<vmem>>, %arg5: memref<1x256xf32, #tpu.memory_space<vmem>>, %arg6: memref<24x256xbf16, #tpu.memory_space<vmem>>, %arg7: memref<1x256xf32, #tpu.memory_space<vmem>>, %arg8: memref<256x256xbf16, #tpu.memory_space<vmem>>, %arg9: memref<1x256xf32, #tpu.memory_space<vmem>>, %arg10: memref<256x8xbf16, #tpu.memory_space<vmem>>, %arg11: memref<256x8xbf16, #tpu.memory_space<vmem>>, %arg12: memref<1x8xf32, #tpu.memory_space<vmem>>, %arg13: memref<16x8xf32, #tpu.memory_space<vmem>>) attributes {dimension_semantics = [#tpu.dimension_semantics<parallel>], iteration_bounds = array<i64: 1>, scalar_prefetch = 0 : i64, scratch_operands = 0 : i64, tpu.core_type = #tpu.core_type<tc>, window_params = [{transform_indices = @transform_0, window_bounds = array<i64: 16, 40>}, {pipeline_mode = #tpu.pipeline_mode<synchronous>, transform_indices = @transform_1, window_bounds = array<i64: 16, 256>}, {pipeline_mode = #tpu.pipeline_mode<synchronous>, transform_indices = @transform_2, window_bounds = array<i64: 1, 256>}, {pipeline_mode = #tpu.pipeline_mode<synchronous>, transform_indices = @transform_3, window_bounds = array<i64: 256, 256>}, {pipeline_mode = #tpu.pipeline_mode<synchronous>, transform_indices = @transform_4, window_bounds = array<i64: 1, 256>}, {pipeline_mode = #tpu.pipeline_mode<synchronous>, transform_indices = @transform_5, window_bounds = array<i64: 24, 256>}, {pipeline_mode = #tpu.pipeline_mode<synchronous>, transform_indices = @transform_6, window_bounds = array<i64: 1, 256>}, {pipeline_mode = #tpu.pipeline_mode<synchronous>, transform_indices = @transform_7, window_bounds = array<i64: 256, 256>}, {pipeline_mode = #tpu.pipeline_mode<synchronous>, transform_indices = @transform_8, window_bounds = array<i64: 1, 256>}, {pipeline_mode = #tpu.pipeline_mode<synchronous>, transform_indices = @transform_9, window_bounds = array<i64: 256, 8>}, {pipeline_mode = #tpu.pipeline_mode<synchronous>, transform_indices = @transform_10, window_bounds = array<i64: 256, 8>}, {pipeline_mode = #tpu.pipeline_mode<synchronous>, transform_indices = @transform_11, window_bounds = array<i64: 1, 8>}, {transform_indices = @transform_12, window_bounds = array<i64: 16, 8>}]} {
    %c0 = arith.constant 0 : index
    %c0_0 = arith.constant 0 : index
    %0 = vector.load %arg1[%c0, %c0_0] : memref<16x40xf32, #tpu.memory_space<vmem>>, vector<16x16xf32>
    %1 = arith.truncf %0 : vector<16x16xf32> to vector<16x16xbf16>
    %c0_1 = arith.constant 0 : index
    %c16 = arith.constant 16 : index
    %2 = vector.load %arg1[%c0_1, %c16] : memref<16x40xf32, #tpu.memory_space<vmem>>, vector<16x24xf32>
    %3 = arith.truncf %2 : vector<16x24xf32> to vector<16x24xbf16>
    %c0_2 = arith.constant 0 : index
    %c0_3 = arith.constant 0 : index
    %4 = vector.load %arg2[%c0_2, %c0_3] : memref<16x256xbf16, #tpu.memory_space<vmem>>, vector<16x256xbf16>
    %cst = arith.constant dense<0.000000e+00> : vector<16x256xf32>
    %5 = tpu.matmul %1, %4, %cst {dimension_numbers = #tpu.dot_dimension_numbers<[1], [0], [0], [1], [0, 0, 1, 1], [], []>} : vector<16x16xbf16>, vector<16x256xbf16>, vector<16x256xf32> -> vector<16x256xf32>
    %c0_4 = arith.constant 0 : index
    %c0_5 = arith.constant 0 : index
    %6 = vector.load %arg3[%c0_4, %c0_5] : memref<1x256xf32, #tpu.memory_space<vmem>>, vector<1x256xf32>
    %7 = vector.broadcast %6 : vector<1x256xf32> to vector<16x256xf32>
    %8 = arith.addf %5, %7 : vector<16x256xf32>
    %cst_6 = arith.constant 0.000000e+00 : f32
    %9 = vector.broadcast %cst_6 : f32 to vector<16x256xf32>
    %10 = arith.maximumf %8, %9 : vector<16x256xf32>
    %11 = arith.truncf %10 : vector<16x256xf32> to vector<16x256xbf16>
    %c0_7 = arith.constant 0 : index
    %c0_8 = arith.constant 0 : index
    %12 = vector.load %arg4[%c0_7, %c0_8] : memref<256x256xbf16, #tpu.memory_space<vmem>>, vector<256x256xbf16>
    %cst_9 = arith.constant dense<0.000000e+00> : vector<16x256xf32>
    %13 = tpu.matmul %11, %12, %cst_9 {dimension_numbers = #tpu.dot_dimension_numbers<[1], [0], [0], [1], [0, 0, 1, 1], [], []>} : vector<16x256xbf16>, vector<256x256xbf16>, vector<16x256xf32> -> vector<16x256xf32>
    %c0_10 = arith.constant 0 : index
    %c0_11 = arith.constant 0 : index
    %14 = vector.load %arg5[%c0_10, %c0_11] : memref<1x256xf32, #tpu.memory_space<vmem>>, vector<1x256xf32>
    %15 = vector.broadcast %14 : vector<1x256xf32> to vector<16x256xf32>
    %16 = arith.addf %13, %15 : vector<16x256xf32>
    %cst_12 = arith.constant 0.000000e+00 : f32
    %17 = vector.broadcast %cst_12 : f32 to vector<16x256xf32>
    %18 = arith.maximumf %16, %17 : vector<16x256xf32>
    %c0_13 = arith.constant 0 : index
    %c0_14 = arith.constant 0 : index
    %19 = vector.load %arg6[%c0_13, %c0_14] : memref<24x256xbf16, #tpu.memory_space<vmem>>, vector<24x256xbf16>
    %cst_15 = arith.constant dense<0.000000e+00> : vector<16x256xf32>
    %20 = tpu.matmul %3, %19, %cst_15 {dimension_numbers = #tpu.dot_dimension_numbers<[1], [0], [0], [1], [0, 0, 1, 1], [], []>} : vector<16x24xbf16>, vector<24x256xbf16>, vector<16x256xf32> -> vector<16x256xf32>
    %c0_16 = arith.constant 0 : index
    %c0_17 = arith.constant 0 : index
    %21 = vector.load %arg7[%c0_16, %c0_17] : memref<1x256xf32, #tpu.memory_space<vmem>>, vector<1x256xf32>
    %22 = vector.broadcast %21 : vector<1x256xf32> to vector<16x256xf32>
    %23 = arith.addf %20, %22 : vector<16x256xf32>
    %cst_18 = arith.constant 0.000000e+00 : f32
    %24 = vector.broadcast %cst_18 : f32 to vector<16x256xf32>
    %25 = arith.maximumf %23, %24 : vector<16x256xf32>
    %26 = arith.truncf %25 : vector<16x256xf32> to vector<16x256xbf16>
    %c0_19 = arith.constant 0 : index
    %c0_20 = arith.constant 0 : index
    %27 = vector.load %arg8[%c0_19, %c0_20] : memref<256x256xbf16, #tpu.memory_space<vmem>>, vector<256x256xbf16>
    %cst_21 = arith.constant dense<0.000000e+00> : vector<16x256xf32>
    %28 = tpu.matmul %26, %27, %cst_21 {dimension_numbers = #tpu.dot_dimension_numbers<[1], [0], [0], [1], [0, 0, 1, 1], [], []>} : vector<16x256xbf16>, vector<256x256xbf16>, vector<16x256xf32> -> vector<16x256xf32>
    %c0_22 = arith.constant 0 : index
    %c0_23 = arith.constant 0 : index
    %29 = vector.load %arg9[%c0_22, %c0_23] : memref<1x256xf32, #tpu.memory_space<vmem>>, vector<1x256xf32>
    %30 = vector.broadcast %29 : vector<1x256xf32> to vector<16x256xf32>
    %31 = arith.addf %28, %30 : vector<16x256xf32>
    %cst_24 = arith.constant 0.000000e+00 : f32
    %32 = vector.broadcast %cst_24 : f32 to vector<16x256xf32>
    %33 = arith.maximumf %31, %32 : vector<16x256xf32>
    %34 = arith.truncf %18 : vector<16x256xf32> to vector<16x256xbf16>
    %c0_25 = arith.constant 0 : index
    %c0_26 = arith.constant 0 : index
    %35 = vector.load %arg10[%c0_25, %c0_26] : memref<256x8xbf16, #tpu.memory_space<vmem>>, vector<256x8xbf16>
    %cst_27 = arith.constant dense<0.000000e+00> : vector<16x8xf32>
    %36 = tpu.matmul %34, %35, %cst_27 {dimension_numbers = #tpu.dot_dimension_numbers<[1], [0], [0], [1], [0, 0, 1, 1], [], []>} : vector<16x256xbf16>, vector<256x8xbf16>, vector<16x8xf32> -> vector<16x8xf32>
    %37 = arith.truncf %33 : vector<16x256xf32> to vector<16x256xbf16>
    %c0_28 = arith.constant 0 : index
    %c0_29 = arith.constant 0 : index
    %38 = vector.load %arg11[%c0_28, %c0_29] : memref<256x8xbf16, #tpu.memory_space<vmem>>, vector<256x8xbf16>
    %cst_30 = arith.constant dense<0.000000e+00> : vector<16x8xf32>
    %39 = tpu.matmul %37, %38, %cst_30 {dimension_numbers = #tpu.dot_dimension_numbers<[1], [0], [0], [1], [0, 0, 1, 1], [], []>} : vector<16x256xbf16>, vector<256x8xbf16>, vector<16x8xf32> -> vector<16x8xf32>
    %40 = arith.addf %36, %39 : vector<16x8xf32>
    %c0_31 = arith.constant 0 : index
    %c0_32 = arith.constant 0 : index
    %41 = vector.load %arg12[%c0_31, %c0_32] : memref<1x8xf32, #tpu.memory_space<vmem>>, vector<1x8xf32>
    %42 = vector.broadcast %41 : vector<1x8xf32> to vector<16x8xf32>
    %43 = arith.addf %40, %42 : vector<16x8xf32>
    %c0_33 = arith.constant 0 : index
    %c0_34 = arith.constant 0 : index
    %44 = vector.load %arg13[%c0_33, %c0_34] : memref<16x8xf32, #tpu.memory_space<vmem>>, vector<16x8xf32>
    tpu.vector_store %arg13[%c0_33, %c0_34], %43 {strides = array<i32>} : memref<16x8xf32, #tpu.memory_space<vmem>>, vector<16x8xf32>,
    return
  }
  func.func @transform_0(%arg0: i32) -> (i32, i32) {
    %c0_i32 = arith.constant 0 : i32
    %c0_i32_0 = arith.constant 0 : i32
    return %arg0, %c0_i32 : i32, i32
  }
  func.func @transform_1(%arg0: i32) -> (i32, i32) {
    %c0_i32 = arith.constant 0 : i32
    %c0_i32_0 = arith.constant 0 : i32
    %c0_i32_1 = arith.constant 0 : i32
    return %c0_i32, %c0_i32_0 : i32, i32
  }
  func.func @transform_2(%arg0: i32) -> (i32, i32) {
    %c0_i32 = arith.constant 0 : i32
    %c0_i32_0 = arith.constant 0 : i32
    %c0_i32_1 = arith.constant 0 : i32
    return %c0_i32, %c0_i32_0 : i32, i32
  }
  func.func @transform_3(%arg0: i32) -> (i32, i32) {
    %c0_i32 = arith.constant 0 : i32
    %c0_i32_0 = arith.constant 0 : i32
    %c0_i32_1 = arith.constant 0 : i32
    return %c0_i32, %c0_i32_0 : i32, i32
  }
  func.func @transform_4(%arg0: i32) -> (i32, i32) {
    %c0_i32 = arith.constant 0 : i32
    %c0_i32_0 = arith.constant 0 : i32
    %c0_i32_1 = arith.constant 0 : i32
    return %c0_i32, %c0_i32_0 : i32, i32
  }
  func.func @transform_5(%arg0: i32) -> (i32, i32) {
    %c0_i32 = arith.constant 0 : i32
    %c0_i32_0 = arith.constant 0 : i32
    %c0_i32_1 = arith.constant 0 : i32
    return %c0_i32, %c0_i32_0 : i32, i32
  }
  func.func @transform_6(%arg0: i32) -> (i32, i32) {
    %c0_i32 = arith.constant 0 : i32
    %c0_i32_0 = arith.constant 0 : i32
    %c0_i32_1 = arith.constant 0 : i32
    return %c0_i32, %c0_i32_0 : i32, i32
  }
  func.func @transform_7(%arg0: i32) -> (i32, i32) {
    %c0_i32 = arith.constant 0 : i32
    %c0_i32_0 = arith.constant 0 : i32
    %c0_i32_1 = arith.constant 0 : i32
    return %c0_i32, %c0_i32_0 : i32, i32
  }
  func.func @transform_8(%arg0: i32) -> (i32, i32) {
    %c0_i32 = arith.constant 0 : i32
    %c0_i32_0 = arith.constant 0 : i32
    %c0_i32_1 = arith.constant 0 : i32
    return %c0_i32, %c0_i32_0 : i32, i32
  }
  func.func @transform_9(%arg0: i32) -> (i32, i32) {
    %c0_i32 = arith.constant 0 : i32
    %c0_i32_0 = arith.constant 0 : i32
    %c0_i32_1 = arith.constant 0 : i32
    return %c0_i32, %c0_i32_0 : i32, i32
  }
  func.func @transform_10(%arg0: i32) -> (i32, i32) {
    %c0_i32 = arith.constant 0 : i32
    %c0_i32_0 = arith.constant 0 : i32
    %c0_i32_1 = arith.constant 0 : i32
    return %c0_i32, %c0_i32_0 : i32, i32
  }
  func.func @transform_11(%arg0: i32) -> (i32, i32) {
    %c0_i32 = arith.constant 0 : i32
    %c0_i32_0 = arith.constant 0 : i32
    %c0_i32_1 = arith.constant 0 : i32
    return %c0_i32, %c0_i32_0 : i32, i32
  }
  func.func @transform_12(%arg0: i32) -> (i32, i32) {
    %c0_i32 = arith.constant 0 : i32
    %c0_i32_0 = arith.constant 0 : i32
    return %arg0, %c0_i32 : i32, i32
  }
}

</mosaic_0001>

<bundles_post_ra>
// kernel: mlp_dual_forward.1
= control target key start
LH: loop header
LB: loop body
LE: loop exit
PB: predicated region body
PF: predicated region fallthrough
CT: control target
= control target key end

     0   :  { %17 = vsyncpa [#allocation3], 0  ;;  %s2064_s0 = inlined_call_operand.vmem [shape: f32[16,40], index: 0, kind: input, shape index: {}]   ;;  %s2065_s1 = inlined_call_operand.hbm [shape: bf16[16,256], index: 1, kind: input, shape index: {}]   ;;  %s2066_s2 = inlined_call_operand.hbm [shape: f32[1,256], index: 2, kind: input, shape index: {}]   ;;  %s2067_s3 = inlined_call_operand.vmem [shape: bf16[256,256], index: 3, kind: input, shape index: {}]   ;;  %s2068_s4 = inlined_call_operand.vmem [shape: f32[1,256], index: 4, kind: input, shape index: {}]   ;;  %s2069_s5 = inlined_call_operand.vmem [shape: bf16[24,256], index: 5, kind: input, shape index: {}]   ;;  %s2070_s6 = inlined_call_operand.vmem [shape: f32[1,256], index: 6, kind: input, shape index: {}]   ;;  %s2071_s7 = inlined_call_operand.hbm [shape: bf16[256,256], index: 7, kind: input, shape index: {}]   ;;  %s2072_s8 = inlined_call_operand.vmem [shape: f32[1,256], index: 8, kind: input, shape index: {}]   ;;  %s2073_s9 = inlined_call_operand.vmem [shape: bf16[256,8], index: 9, kind: input, shape index: {}]   ;;  %s2074_s10 = inlined_call_operand.vmem [shape: bf16[256,8], index: 10, kind: input, shape index: {}]   ;;  %s2075_s11 = inlined_call_operand.vmem [shape: f32[1,8], index: 11, kind: input, shape index: {}]   ;;  %s2076_s12 = inlined_call_operand.vmem [shape: f32[16,8], index: 12, kind: output, shape index: {}]  }
   0x1   :  { %18 = vsyncpa [#allocation5], 0  ;;  %s39_s23 = sshll.u32 %s2066_s2, 4  ;;  %s1652_s24 = smov [#allocation4]   ;;  %s40_s23 = int_to_ptr.hbm [resolvable:$true] %s39_s23 }
   0x2   :  { %s41_s25 = sshll.u32 %s1652_s24, 4  ;;  %s25_s28 = sshll.u32 %s2065_s1, 4  ;;  %s42_s25 = int_to_ptr.vmem [resolvable:$true] %s41_s25  ;;  %s26_s28 = int_to_ptr.hbm [resolvable:$true] %s25_s28 }
   0x3   :  { %44 = dma.hbm_to_vmem [thread:$0]  %s40_s23, 32, %s42_s25, [#allocation5]  }
   0x4   :  { %s1653_s29 = smov [#allocation2]   ;;  %s1654_s13 = smov 128  }
   0x5   :  { %s27_s30 = sshll.u32 %s1653_s29, 4  ;;  %s1655_s14 = smov 8   ;;  %s28_s30 = int_to_ptr.vmem [resolvable:$true] %s27_s30 }
   0x6   :  { %33 = dma.hbm_to_vmem [thread:$0]  %s26_s28, 256, %s28_s30, [#allocation3], %s1654_s13, %s1654_s13, %s1655_s14  }
   0x7   :  { %s57_s2 = sshll.u32 %s2071_s7, 4  ;;  %s1656_s17 = smov [#allocation6]   ;;  %s58_s2 = int_to_ptr.hbm [resolvable:$true] %s57_s2 }
   0x8   :  { %s59_s18 = sshll.u32 %s1656_s17, 4  ;;  %s60_s18 = int_to_ptr.vmem [resolvable:$true] %s59_s18 }
   0x9   :  { %65 = dma.hbm_to_vmem [thread:$0]  %s58_s2, 4096, %s60_s18, [#allocation5], %s1654_s13, %s1654_s13, %s1655_s14  }
   0xa   :  { %1648 = dma.done.wait [#allocation3], 256  }
   0xb   :  { %1649 = vsyncadd [#allocation3], 4294967040 }
   0xc   :  { %1650 = dma.done.wait [#allocation5], 4128  }
   0xd   :  { %1651 = vsyncadd [#allocation5], 4294963168  ;;  %v1067_v0 = vld [vmem:[#allocation2] sm:$0xf]  ;;  %v1470_v1 = vld [vmem:[#allocation2 + $0x4] sm:$0xf0] }
   0xe   :  { %v1469_v2 = vld [vmem:[#allocation2 + $0x4] sm:$0xf]  ;;  %v1068_v3 = vor.u32 %v1470_v1, %v1067_v0  ;;  %v1069_v4 = vld [vmem:[#allocation2 + $0x8] sm:$0xf0]  ;;  %vm108_vm0 = vcmask 130048   ;;  %s1657_s14 = smov 112  }
   0xf   :  { %v87_v5 = vld [vmem:[%s2064_s0] sm:$0xff]  ;;  %v88_v6 = vld [vmem:[%s2064_s0 + $0x8] sm:$0xff]  ;;  %v1072_v7 = vor.u32 %v1469_v2, %v1069_v4  ;;  %v1133_v9 = vld [vmem:[%s2067_s3 + $0x70] sm:$0xf]  ;;  %vm435_vm1 = vcmask 1043456   ;;  %vm431_vm2 = vcmask 195584  }
  0x10   :  { %v89_v8 = vpack.c.bf16 %v88_v6, %v87_v5  ;;  %v1486_v10 = vld [vmem:[%s2067_s3 + $0x74] sm:$0xf0]  ;;  %v1197_v11 = vld [vmem:[%s2067_s3 + $0xf0] sm:$0xf]  ;;  %119 = vmatpush.bf16.msra.mxu0 %v1068_v3  ;;  %v1485_v14 = vld [vmem:[%s2067_s3 + $0x74] sm:$0xf] }
  0x11   :  { %v1134_v12 = vor.u32 %v1486_v10, %v1133_v9  ;;  %v1502_v13 = vld [vmem:[%s2067_s3 + $0xf4] sm:$0xf0]  ;;  %v1135_v15 = vld [vmem:[%s2067_s3 + $0x78] sm:$0xf0]  ;;  %133 = vmatpush.bf16.msra.mxu1 %v1072_v7  ;;  %v1501_v18 = vld [vmem:[%s2067_s3 + $0xf4] sm:$0xf] }
  0x12   :  { %414 = vrot.lane.b32.xlu0 %v89_v8, %s1657_s14  ;;  %v1198_v16 = vor.u32 %v1502_v13, %v1197_v11  ;;  %v1138_v17 = vor.u32 %v1485_v14, %v1135_v15  ;;  %v1199_v19 = vld [vmem:[%s2067_s3 + $0xf8] sm:$0xf0]  ;;  %v1125_v20 = vld [vmem:[%s2067_s3 + $0x60] sm:$0xf]  ;;  %v1484_v22 = vld [vmem:[%s2067_s3 + $0x64] sm:$0xf0] }
  0x13   :  { %344 = vmatpush.bf16.msra.mxu2 %v1134_v12  ;;  %v1202_v21 = vor.u32 %v1501_v18, %v1199_v19  ;;  %v1189_v23 = vld [vmem:[%s2067_s3 + $0xe0] sm:$0xf]  ;;  %v1500_v24 = vld [vmem:[%s2067_s3 + $0xe4] sm:$0xf0]  ;;  %1073 = vmatmul.msk.bf16.vlgmr.msra.gmra.mxu0 %vm108_vm0, %v89_v8  ;;  %v1126_v25 = vor.u32 %v1484_v22, %v1125_v20  ;;  %v1483_v27 = vld [vmem:[%s2067_s3 + $0x64] sm:$0xf] }
  0x14   :  { %358 = vmatpush.bf16.msra.mxu3 %v1198_v16  ;;  %v1190_v26 = vor.u32 %v1500_v24, %v1189_v23  ;;  %v1127_v28 = vld [vmem:[%s2067_s3 + $0x68] sm:$0xf0]  ;;  %v1499_v29 = vld [vmem:[%s2067_s3 + $0xe4] sm:$0xf]  ;;  %1074 = vmatmul.msk.bf16.vlgmr.msra.gmra.mxu1 %vm108_vm0, %v89_v8  ;;  %v1117_v32 = vld [vmem:[%s2067_s3 + $0x50] sm:$0xf] }
  0x15   :  { %372 = vmatpush.bf16.msrb.mxu0 %v1138_v17  ;;  %v1130_v30 = vor.u32 %v1483_v27, %v1127_v28  ;;  %v1191_v31 = vld [vmem:[%s2067_s3 + $0xe8] sm:$0xf0]  ;;  %v1482_v33 = vld [vmem:[%s2067_s3 + $0x54] sm:$0xf0]  ;;  %386 = vmatpush.bf16.msrb.mxu1 %v1202_v21  ;;  %v1181_v35 = vld [vmem:[%s2067_s3 + $0xd0] sm:$0xf] }
  0x16   :  { %v1194_v34 = vor.u32 %v1499_v29, %v1191_v31  ;;  %v1498_v36 = vld [vmem:[%s2067_s3 + $0xd4] sm:$0xf0]  ;;  %v1481_v37 = vld [vmem:[%s2067_s3 + $0x54] sm:$0xf]  ;;  %v1118_v38 = vor.u32 %v1482_v33, %v1117_v32  ;;  %v1119_v39 = vld [vmem:[%s2067_s3 + $0x58] sm:$0xf0] }
  0x17   :  { %345 = vmatpush.bf16.msra.mxu2 %v1126_v25  ;;  %v1497_v40 = vld [vmem:[%s2067_s3 + $0xd4] sm:$0xf]  ;;  %v1183_v41 = vld [vmem:[%s2067_s3 + $0xd8] sm:$0xf0]  ;;  %v1182_v42 = vor.u32 %v1498_v36, %v1181_v35  ;;  %v1109_v43 = vld [vmem:[%s2067_s3 + $0x40] sm:$0xf]  ;;  %v1122_v45 = vor.u32 %v1481_v37, %v1119_v39 }
  0x18   :  { %359 = vmatpush.bf16.msra.mxu3 %v1190_v26  ;;  %v1480_v44 = vld [vmem:[%s2067_s3 + $0x44] sm:$0xf0]  ;;  %v1173_v46 = vld [vmem:[%s2067_s3 + $0xc0] sm:$0xf]  ;;  %v1186_v48 = vor.u32 %v1497_v40, %v1183_v41  ;;  %v1479_v49 = vld [vmem:[%s2067_s3 + $0x44] sm:$0xf] }
  0x19   :  { %373 = vmatpush.bf16.msrb.mxu0 %v1130_v30  ;;  %v1496_v47 = vld [vmem:[%s2067_s3 + $0xc4] sm:$0xf0]  ;;  %387 = vmatpush.bf16.msrb.mxu1 %v1194_v34  ;;  %v1111_v50 = vld [vmem:[%s2067_s3 + $0x48] sm:$0xf0]  ;;  %v1110_v51 = vor.u32 %v1480_v44, %v1109_v43  ;;  %v1495_v52 = vld [vmem:[%s2067_s3 + $0xc4] sm:$0xf] }
  0x1a   :  { %v1175_v53 = vld [vmem:[%s2067_s3 + $0xc8] sm:$0xf0]  ;;  %v1174_v54 = vor.u32 %v1496_v47, %v1173_v46  ;;  %v1114_v55 = vor.u32 %v1479_v49, %v1111_v50  ;;  %v1101_v57 = vld [vmem:[%s2067_s3 + $0x30] sm:$0xf]  ;;  %v1478_v58 = vld [vmem:[%s2067_s3 + $0x34] sm:$0xf0] }
  0x1b   :  { %346 = vmatpush.bf16.msra.mxu2 %v1118_v38  ;;  %v1178_v56 = vor.u32 %v1495_v52, %v1175_v53  ;;  %v1165_v59 = vld [vmem:[%s2067_s3 + $0xb0] sm:$0xf]  ;;  %v1102_v60 = vor.u32 %v1478_v58, %v1101_v57  ;;  %v1494_v61 = vld [vmem:[%s2067_s3 + $0xb4] sm:$0xf0]  ;;  %v1477_v62 = vld [vmem:[%s2067_s3 + $0x34] sm:$0xf] }
  0x1c   :  { %360 = vmatpush.bf16.msra.mxu3 %v1182_v42  ;;  %v1103_v63 = vld [vmem:[%s2067_s3 + $0x38] sm:$0xf0]  ;;  %v1166_v0 = vor.u32 %v1494_v61, %v1165_v59  ;;  %v1493_v2 = vld [vmem:[%s2067_s3 + $0xb4] sm:$0xf]  ;;  %v1093_v5 = vld [vmem:[%s2067_s3 + $0x20] sm:$0xf] }
  0x1d   :  { %374 = vmatpush.bf16.msrb.mxu0 %v1122_v45  ;;  %388 = vmatpush.bf16.msrb.mxu1 %v1186_v48  ;;  %v1106_v1 = vor.u32 %v1477_v62, %v1103_v63  ;;  %v1167_v3 = vld [vmem:[%s2067_s3 + $0xb8] sm:$0xf0]  ;;  %v1476_v6 = vld [vmem:[%s2067_s3 + $0x24] sm:$0xf0]  ;;  %v1157_v8 = vld [vmem:[%s2067_s3 + $0xa0] sm:$0xf] }
  0x1e   :  { %v1170_v4 = vor.u32 %v1493_v2, %v1167_v3  ;;  %v1094_v7 = vor.u32 %v1476_v6, %v1093_v5  ;;  %v1492_v9 = vld [vmem:[%s2067_s3 + $0xa4] sm:$0xf0]  ;;  %v1475_v10 = vld [vmem:[%s2067_s3 + $0x24] sm:$0xf]  ;;  %v1095_v12 = vld [vmem:[%s2067_s3 + $0x28] sm:$0xf0] }
  0x1f   :  { %347 = vmatpush.bf16.msra.mxu2 %v1110_v51  ;;  %v1158_v11 = vor.u32 %v1492_v9, %v1157_v8  ;;  %v1491_v13 = vld [vmem:[%s2067_s3 + $0xa4] sm:$0xf]  ;;  %v1159_v14 = vld [vmem:[%s2067_s3 + $0xa8] sm:$0xf0]  ;;  %v1098_v15 = vor.u32 %v1475_v10, %v1095_v12  ;;  %v1085_v17 = vld [vmem:[%s2067_s3 + $0x10] sm:$0xf] }
  0x20   :  { %361 = vmatpush.bf16.msra.mxu3 %v1174_v54  ;;  %v1162_v16 = vor.u32 %v1491_v13, %v1159_v14  ;;  %v1474_v18 = vld [vmem:[%s2067_s3 + $0x14] sm:$0xf0]  ;;  %v1149_v19 = vld [vmem:[%s2067_s3 + $0x90] sm:$0xf]  ;;  %v1473_v22 = vld [vmem:[%s2067_s3 + $0x14] sm:$0xf] }
  0x21   :  { %375 = vmatpush.bf16.msrb.mxu0 %v1114_v55  ;;  %389 = vmatpush.bf16.msrb.mxu1 %v1178_v56  ;;  %v1086_v20 = vor.u32 %v1474_v18, %v1085_v17  ;;  %v1490_v21 = vld [vmem:[%s2067_s3 + $0x94] sm:$0xf0]  ;;  %v1087_v23 = vld [vmem:[%s2067_s3 + $0x18] sm:$0xf0]  ;;  %v1489_v26 = vld [vmem:[%s2067_s3 + $0x94] sm:$0xf] }
  0x22   :  { %v1150_v24 = vor.u32 %v1490_v21, %v1149_v19  ;;  %v1090_v25 = vor.u32 %v1473_v22, %v1087_v23  ;;  %v1151_v27 = vld [vmem:[%s2067_s3 + $0x98] sm:$0xf0]  ;;  %v1077_v29 = vld [vmem:[%s2067_s3] sm:$0xf]  ;;  %v1472_v30 = vld [vmem:[%s2067_s3 + $0x4] sm:$0xf0] }
  0x23   :  { %348 = vmatpush.bf16.msra.mxu2 %v1102_v60  ;;  %v1154_v28 = vor.u32 %v1489_v26, %v1151_v27  ;;  %v1141_v31 = vld [vmem:[%s2067_s3 + $0x80] sm:$0xf]  ;;  %v1078_v32 = vor.u32 %v1472_v30, %v1077_v29  ;;  %v1488_v33 = vld [vmem:[%s2067_s3 + $0x84] sm:$0xf0]  ;;  %v1471_v34 = vld [vmem:[%s2067_s3 + $0x4] sm:$0xf] }
  0x24   :  { %362 = vmatpush.bf16.msra.mxu3 %v1166_v0  ;;  %v1079_v35 = vld [vmem:[%s2067_s3 + $0x8] sm:$0xf0]  ;;  %v1142_v36 = vor.u32 %v1488_v33, %v1141_v31  ;;  %v1487_v38 = vld [vmem:[%s2067_s3 + $0x84] sm:$0xf]  ;;  %v406_v41 = vld [vmem:[%s2069_s5 + $0x10] sm:$0xff]  ;;  %vm1056_vm3 = vcmask 64512  }
  0x25   :  { %376 = vmatpush.bf16.msrb.mxu0 %v1106_v1  ;;  %390 = vmatpush.bf16.msrb.mxu1 %v1170_v4  ;;  %v1082_v37 = vor.u32 %v1471_v34, %v1079_v35  ;;  %v1143_v39 = vld [vmem:[%s2067_s3 + $0x88] sm:$0xf0]  ;;  %v423_v42 = vunpack.c.l.b16 %v406_v41  ;;  %v424_v43 = vunpack.c.h.b16 %v406_v41  ;;  %v1205_v44 = vld [vmem:[%s2069_s5] sm:$0xf]  ;;  %v1504_v47 = vld [vmem:[%s2069_s5 + $0x4] sm:$0xf0] }
  0x26   :  { %v1146_v40 = vor.u32 %v1487_v38, %v1143_v39  ;;  %v1503_v48 = vld [vmem:[%s2069_s5 + $0x4] sm:$0xf]  ;;  %v1207_v49 = vld [vmem:[%s2069_s5 + $0x8] sm:$0xf0]  ;;  %v1206_v52 = vor.u32 %v1504_v47, %v1205_v44  ;;  %v92_v54 = vld [vmem:[#allocation4] sm:$0x3] }
  0x27   :  { %349 = vmatpush.bf16.msra.mxu2 %v1094_v7  ;;  %v427_v45 = vpack.c.b16 %v423_v42, %v423_v42  ;;  %v428_v46 = vpack.c.b16 %v424_v43, %v424_v43  ;;  %v1210_v53 = vor.u32 %v1503_v48, %v1207_v49  ;;  %v94_v57 = vperm.slane %v92_v54, 0  ;;  %v1519_v0 = vld [vmem:[#allocation6 + $0x74] sm:$0xf]  ;;  %v1273_v2 = vld [vmem:[#allocation6 + $0x78] sm:$0xf0] }
  0x28   :  { %363 = vmatpush.bf16.msra.mxu3 %v1158_v11  ;;  %v95_v58 = vperm.slane %v92_v54, 1  ;;  %v1535_v3 = vld [vmem:[#allocation6 + $0xf4] sm:$0xf]  ;;  %v1337_v4 = vld [vmem:[#allocation6 + $0xf8] sm:$0xf0]  ;;  %v1276_v10 = vor.u32 %v1519_v0, %v1273_v2 }
  0x29   :  { %377 = vmatpush.bf16.msrb.mxu0 %v1098_v15  ;;  %391 = vmatpush.bf16.msrb.mxu1 %v1162_v16  ;;  %v437_v50 = vsel %vm435_vm1, %v427_v45, 0  ;;  %v440_v51 = vsel %vm435_vm1, %v428_v46, 0  ;;  %v1340_v11 = vor.u32 %v1535_v3, %v1337_v4  ;;  %v1517_v12 = vld [vmem:[#allocation6 + $0x64] sm:$0xf]  ;;  %v1265_v14 = vld [vmem:[#allocation6 + $0x68] sm:$0xf0] }
  0x2a   :  { %v1533_v15 = vld [vmem:[#allocation6 + $0xe4] sm:$0xf]  ;;  %v1329_v16 = vld [vmem:[#allocation6 + $0xe8] sm:$0xf0]  ;;  %v1268_v17 = vor.u32 %v1517_v12, %v1265_v14  ;;  %v1257_v21 = vld [vmem:[#allocation6 + $0x58] sm:$0xf0] }
  0x2b   :  { %350 = vmatpush.bf16.msra.mxu2 %v1086_v20  ;;  %v1332_v18 = vor.u32 %v1533_v15, %v1329_v16  ;;  %v1515_v20 = vld [vmem:[#allocation6 + $0x54] sm:$0xf]  ;;  %v1513_v26 = vld [vmem:[#allocation6 + $0x44] sm:$0xf]  ;;  %v1249_v27 = vld [vmem:[#allocation6 + $0x48] sm:$0xf0] }
  0x2c   :  { %364 = vmatpush.bf16.msra.mxu3 %v1150_v24  ;;  %v1531_v22 = vld [vmem:[#allocation6 + $0xd4] sm:$0xf]  ;;  %v1260_v23 = vor.u32 %v1515_v20, %v1257_v21  ;;  %v1321_v24 = vld [vmem:[#allocation6 + $0xd8] sm:$0xf0]  ;;  %v1252_v29 = vor.u32 %v1513_v26, %v1249_v27  ;;  %v1313_v30 = vld [vmem:[#allocation6 + $0xc8] sm:$0xf0] }
  0x2d   :  { %378 = vmatpush.bf16.msrb.mxu0 %v1090_v25  ;;  %392 = vmatpush.bf16.msrb.mxu1 %v1154_v28  ;;  %v1324_v25 = vor.u32 %v1531_v22, %v1321_v24  ;;  %v1529_v28 = vld [vmem:[#allocation6 + $0xc4] sm:$0xf]  ;;  %v1271_v31 = vld [vmem:[#allocation6 + $0x70] sm:$0xf]  ;;  %v1511_v38 = vld [vmem:[#allocation6 + $0x34] sm:$0xf] }
  0x2e   :  { %v1316_v33 = vor.u32 %v1529_v28, %v1313_v30  ;;  %v1335_v35 = vld [vmem:[#allocation6 + $0xf0] sm:$0xf]  ;;  %v1241_v39 = vld [vmem:[#allocation6 + $0x38] sm:$0xf0]  ;;  %v1263_v43 = vld [vmem:[#allocation6 + $0x60] sm:$0xf] }
  0x2f   :  { %351 = vmatpush.bf16.msra.mxu2 %v1078_v32  ;;  %v1520_v32 = vld [vmem:[#allocation6 + $0x74] sm:$0xf0]  ;;  %v1244_v41 = vor.u32 %v1511_v38, %v1241_v39  ;;  %v1305_v42 = vld [vmem:[#allocation6 + $0xb8] sm:$0xf0]  ;;  %v1518_v44 = vld [vmem:[#allocation6 + $0x64] sm:$0xf0] }
  0x30   :  { %365 = vmatpush.bf16.msra.mxu3 %v1142_v36  ;;  %v1272_v34 = vor.u32 %v1520_v32, %v1271_v31  ;;  %v1536_v36 = vld [vmem:[#allocation6 + $0xf4] sm:$0xf0]  ;;  %v1264_v46 = vor.u32 %v1518_v44, %v1263_v43  ;;  %v1327_v47 = vld [vmem:[#allocation6 + $0xe0] sm:$0xf]  ;;  %v1534_v48 = vld [vmem:[#allocation6 + $0xe4] sm:$0xf0] }
  0x31   :  { %379 = vmatpush.bf16.msrb.mxu0 %v1082_v37  ;;  %393 = vmatpush.bf16.msrb.mxu1 %v1146_v40  ;;  %v1336_v37 = vor.u32 %v1536_v36, %v1335_v35  ;;  %v1527_v40 = vld [vmem:[#allocation6 + $0xb4] sm:$0xf]  ;;  %v1328_v49 = vor.u32 %v1534_v48, %v1327_v47  ;;  %v1297_v54 = vld [vmem:[#allocation6 + $0xa8] sm:$0xf0]  ;;  %v1289_v2 = vld [vmem:[#allocation6 + $0x98] sm:$0xf0] }
  0x32   :  { %v1308_v45 = vor.u32 %v1527_v40, %v1305_v42  ;;  %v1523_v0 = vld [vmem:[#allocation6 + $0x94] sm:$0xf]  ;;  %v1247_v3 = vld [vmem:[#allocation6 + $0x40] sm:$0xf]  ;;  %v1514_v4 = vld [vmem:[#allocation6 + $0x44] sm:$0xf0] }
  0x33   :  { %448 = vmatpush.bf16.msrb.mxu2 %v437_v50  ;;  %v1509_v50 = vld [vmem:[#allocation6 + $0x24] sm:$0xf]  ;;  %v1281_v14 = vld [vmem:[#allocation6 + $0x88] sm:$0xf0]  ;;  %v1239_v15 = vld [vmem:[#allocation6 + $0x30] sm:$0xf] }
  0x34   :  { %462 = vmatpush.bf16.msrb.mxu3 %v440_v51  ;;  %v1233_v51 = vld [vmem:[#allocation6 + $0x28] sm:$0xf0]  ;;  %v1521_v12 = vld [vmem:[#allocation6 + $0x84] sm:$0xf]  ;;  %v1512_v16 = vld [vmem:[#allocation6 + $0x34] sm:$0xf0] }
  0x35   :  { %674 = vmatpush.bf16.msra.mxu0 %v1272_v34  ;;  %688 = vmatpush.bf16.msra.mxu1 %v1336_v37  ;;  %v1528_v20 = vld [vmem:[#allocation6 + $0xb4] sm:$0xf0]  ;;  %v1544_v22 = vld [vmem:[%s2073_s9 + $0x38] sm:$0xff]  ;;  %v1231_v24 = vld [vmem:[#allocation6 + $0x20] sm:$0xf] }
  0x36   :  { %v1295_v26 = vld [vmem:[#allocation6 + $0xa0] sm:$0xf]  ;;  %v1526_v28 = vld [vmem:[#allocation6 + $0xa4] sm:$0xf0]  ;;  %v1223_v32 = vld [vmem:[#allocation6 + $0x10] sm:$0xf] }
  0x37   :  { %449 = vmatpush.bf16.msrb.mxu2 %v1206_v52  ;;  %v1525_v52 = vld [vmem:[#allocation6 + $0xa4] sm:$0xf]  ;;  %v1296_v31 = vor.u32 %v1526_v28, %v1295_v26  ;;  %v1287_v34 = vld [vmem:[#allocation6 + $0x90] sm:$0xf]  ;;  %v1524_v36 = vld [vmem:[#allocation6 + $0x94] sm:$0xf0] }
  0x38   :  { %463 = vmatpush.bf16.msrb.mxu3 %v1210_v53  ;;  %v1236_v53 = vor.u32 %v1509_v50, %v1233_v51  ;;  %v1551_v30 = vld [vmem:[%s2073_s9 + $0x70] sm:$0xff]  ;;  %v1542_v37 = vld [vmem:[%s2073_s9 + $0x28] sm:$0xff]  ;;  %v1288_v39 = vor.u32 %v1524_v36, %v1287_v34  ;;  %v1522_v44 = vld [vmem:[#allocation6 + $0x84] sm:$0xf0] }
  0x39   :  { %675 = vmatpush.bf16.msra.mxu0 %v1264_v46  ;;  %689 = vmatpush.bf16.msra.mxu1 %v1328_v49  ;;  %v1550_v38 = vld [vmem:[%s2073_s9 + $0x68] sm:$0xff]  ;;  %v1215_v40 = vld [vmem:[#allocation6] sm:$0xf]  ;;  %v1549_v46 = vld [vmem:[%s2073_s9 + $0x60] sm:$0xff] }
  0x3a   :  { %v1279_v42 = vld [vmem:[#allocation6 + $0x80] sm:$0xf]  ;;  %v1540_v48 = vld [vmem:[%s2073_s9 + $0x18] sm:$0xff] }
  0x3b   :  { %v1280_v47 = vor.u32 %v1522_v44, %v1279_v42  ;;  %v1548_v49 = vld [vmem:[%s2073_s9 + $0x58] sm:$0xff]  ;;  %v1565_v42 = vld [vmem:[%s2074_s10 + $0x60] sm:$0xff] }
  0x3c   :  { %v1564_v44 = vld [vmem:[%s2074_s10 + $0x58] sm:$0xff] }
  0x84   :  { %v415_v19 = vpop.permute.xlu0 %414 }
  0x90   :  { %v121_v55 = vpop.f32.mrf.mxu0 }
  0x91   :  { %v135_v56 = vpop.f32.mrf.mxu1  ;;  %v122_v59 = vadd.f32 %v121_v55, %v94_v57  ;;  %v1255_v55 = vld [vmem:[#allocation6 + $0x50] sm:$0xf] }
  0x92   :  { %v136_v60 = vadd.f32 %v135_v56, %v95_v58  ;;  %v1516_v56 = vld [vmem:[#allocation6 + $0x54] sm:$0xf0] }
  0x93   :  { %v140_v5 = vmax.f32 %v122_v59, 0.0  ;;  %v1319_v59 = vld [vmem:[#allocation6 + $0xd0] sm:$0xf] }
  0x94   :  { %v141_v7 = vmax.f32 %v136_v60, 0.0  ;;  %v1532_v60 = vld [vmem:[#allocation6 + $0xd4] sm:$0xf0] }
  0x98   :  { %v123_v61 = vpop.f32.mrf.mxu0 }
  0x99   :  { %v124_v62 = vadd.f32 %v123_v61, %v94_v57  ;;  %v137_v63 = vpop.f32.mrf.mxu1  ;;  %v1300_v57 = vor.u32 %v1525_v52, %v1297_v54  ;;  %v1320_v61 = vor.u32 %v1532_v60, %v1319_v59  ;;  %v1539_v52 = vld [vmem:[%s2073_s9 + $0x10] sm:$0xff]  ;;  %v1538_v54 = vld [vmem:[%s2073_s9 + $0x8] sm:$0xff]  ;;  %v1545_v59 = vld [vmem:[%s2073_s9 + $0x40] sm:$0xff] }
  0x9a   :  { %v138_v1 = vadd.f32 %v137_v63, %v95_v58  ;;  %v1256_v58 = vor.u32 %v1516_v56, %v1255_v55  ;;  %v1225_v63 = vld [vmem:[#allocation6 + $0x18] sm:$0xf0]  ;;  %v407_v60 = vld [vmem:[%s2070_s6] sm:$0x3] }
  0x9b   :  { %v142_v6 = vmax.f32 %v124_v62, 0.0  ;;  %v1507_v62 = vld [vmem:[#allocation6 + $0x14] sm:$0xf]  ;;  %690 = vmatpush.bf16.msra.mxu1 %v1320_v61 }
  0x9c   :  { %v143_v8 = vmax.f32 %v138_v1, 0.0  ;;  %676 = vmatpush.bf16.msra.mxu0 %v1256_v58  ;;  %v1228_v1 = vor.u32 %v1507_v62, %v1225_v63  ;;  %v1546_v55 = vld [vmem:[%s2073_s9 + $0x48] sm:$0xff]  ;;  %v1537_v58 = vld [vmem:[%s2073_s9] sm:$0xff]  ;;  %v1560_v62 = vld [vmem:[%s2074_s10 + $0x38] sm:$0xff] }
  0x9d   :  { %v144_v9 = vpack.c.bf16 %v142_v6, %v140_v5  ;;  %v1292_v5 = vor.u32 %v1523_v0, %v1289_v2  ;;  %v1248_v6 = vor.u32 %v1514_v4, %v1247_v3  ;;  %v1568_v63 = vld [vmem:[%s2074_s10 + $0x78] sm:$0xff]  ;;  %v1567_v2 = vld [vmem:[%s2074_s10 + $0x70] sm:$0xff]  ;;  %v409_v3 = vperm.slane %v407_v60, 0 }
  0x9e   :  { %v145_v13 = vpack.c.bf16 %v143_v8, %v141_v7  ;;  %v1311_v7 = vld [vmem:[#allocation6 + $0xc0] sm:$0xf]  ;;  %v1530_v8 = vld [vmem:[#allocation6 + $0xc4] sm:$0xf0]  ;;  %v410_v4 = vperm.slane %v407_v60, 1 }
  0x9f   :  { %352 = vmatmul.bf16.vlgmr.msra.gmra.mxu2 %v144_v9  ;;  %380 = vmatmul.bf16.vlgmr.msrb.gmra.mxu0 %v144_v9  ;;  %v1312_v9 = vor.u32 %v1530_v8, %v1311_v7 }
  0xa0   :  { %366 = vmatmul.bf16.vlgmr.msra.gmra.mxu3 %v145_v13  ;;  %394 = vmatmul.bf16.vlgmr.msrb.gmra.mxu1 %v145_v13 }
  0xa1   :  { %702 = vmatpush.bf16.msra.mxu2 %v1276_v10  ;;  %716 = vmatpush.bf16.msra.mxu3 %v1340_v11  ;;  %v1505_v10 = vld [vmem:[#allocation6 + $0x4] sm:$0xf]  ;;  %v1217_v11 = vld [vmem:[#allocation6 + $0x8] sm:$0xf0] }
  0xa2   :  { %677 = vmatpush.bf16.msra.mxu0 %v1248_v6  ;;  %691 = vmatpush.bf16.msra.mxu1 %v1312_v9  ;;  %v1220_v13 = vor.u32 %v1505_v10, %v1217_v11  ;;  %v1558_v6 = vld [vmem:[%s2074_s10 + $0x28] sm:$0xff] }
  0xa5   :  { %703 = vmatpush.bf16.msra.mxu2 %v1268_v17  ;;  %717 = vmatpush.bf16.msra.mxu3 %v1332_v18  ;;  %v1284_v17 = vor.u32 %v1521_v12, %v1281_v14  ;;  %v1240_v18 = vor.u32 %v1512_v16, %v1239_v15 }
  0xa7   :  { %678 = vmatpush.bf16.msra.mxu0 %v1240_v18 }
  0xa9   :  { %704 = vmatpush.bf16.msra.mxu2 %v1260_v23  ;;  %718 = vmatpush.bf16.msra.mxu3 %v1324_v25  ;;  %v1552_v23 = vld [vmem:[%s2073_s9 + $0x78] sm:$0xff] }
  0xaa   :  { %v1510_v25 = vld [vmem:[#allocation6 + $0x24] sm:$0xf0] }
  0xab   :  { %v1232_v27 = vor.u32 %v1510_v25, %v1231_v24 }
  0xad   :  { %705 = vmatpush.bf16.msra.mxu2 %v1252_v29  ;;  %719 = vmatpush.bf16.msra.mxu3 %v1316_v33  ;;  %v1543_v29 = vld [vmem:[%s2073_s9 + $0x30] sm:$0xff]  ;;  %v1508_v33 = vld [vmem:[#allocation6 + $0x14] sm:$0xf0] }
  0xae   :  { %679 = vmatpush.bf16.msra.mxu0 %v1232_v27  ;;  %v1224_v35 = vor.u32 %v1508_v33, %v1223_v32 }
  0xaf   :  { %1211 = vmatmul.msk.bf16.vlgmr.msrb.gmra.mxu2 %vm431_vm2, %v415_v19 }
  0xb0   :  { %1212 = vmatmul.msk.bf16.vlgmr.msrb.gmra.mxu3 %vm431_vm2, %v415_v19  ;;  %v1303_v19 = vld [vmem:[#allocation6 + $0xb0] sm:$0xf] }
  0xb1   :  { %706 = vmatpush.bf16.msra.mxu2 %v1244_v41  ;;  %720 = vmatpush.bf16.msra.mxu3 %v1308_v45  ;;  %v1304_v21 = vor.u32 %v1528_v20, %v1303_v19  ;;  %v1506_v41 = vld [vmem:[#allocation6 + $0x4] sm:$0xf0]  ;;  %v1541_v45 = vld [vmem:[%s2073_s9 + $0x20] sm:$0xff] }
  0xb2   :  { %680 = vmatpush.bf16.msra.mxu0 %v1224_v35  ;;  %v1216_v43 = vor.u32 %v1506_v41, %v1215_v40  ;;  %v178_v19 = vld [vmem:[%s2068_s4] sm:$0x3]  ;;  %v1566_v40 = vld [vmem:[%s2074_s10 + $0x68] sm:$0xff]  ;;  %v1556_v41 = vld [vmem:[%s2074_s10 + $0x18] sm:$0xff] }
  0xb3   :  { %692 = vmatpush.bf16.msra.mxu1 %v1304_v21  ;;  %v181_v24 = vperm.slane %v178_v19, 1 }
  0xb5   :  { %707 = vmatpush.bf16.msra.mxu2 %v1236_v53  ;;  %721 = vmatpush.bf16.msra.mxu3 %v1300_v57  ;;  %v1547_v53 = vld [vmem:[%s2073_s9 + $0x50] sm:$0xff] }
  0xb6   :  { %681 = vmatpush.bf16.msra.mxu0 %v1216_v43  ;;  %v1555_v43 = vld [vmem:[%s2074_s10 + $0x10] sm:$0xff] }
  0xb7   :  { %693 = vmatpush.bf16.msra.mxu1 %v1296_v31 }
  0xb9   :  { %708 = vmatpush.bf16.msra.mxu2 %v1228_v1  ;;  %722 = vmatpush.bf16.msra.mxu3 %v1292_v5  ;;  %v1559_v1 = vld [vmem:[%s2074_s10 + $0x30] sm:$0xff] }
  0xba   :  { %898 = vmatpush.bf16.msrb.mxu0 %v1560_v62 }
  0xbb   :  { %694 = vmatpush.bf16.msra.mxu1 %v1288_v39 }
  0xbd   :  { %709 = vmatpush.bf16.msra.mxu2 %v1220_v13  ;;  %723 = vmatpush.bf16.msra.mxu3 %v1284_v17  ;;  %v1557_v13 = vld [vmem:[%s2074_s10 + $0x20] sm:$0xff] }
  0xbe   :  { %899 = vmatpush.bf16.msrb.mxu0 %v1559_v1 }
  0xbf   :  { %695 = vmatpush.bf16.msra.mxu1 %v1280_v47  ;;  %v1553_v47 = vld [vmem:[%s2074_s10] sm:$0xff] }
  0xc1   :  { %1022 = vmatpush.bf16.msrb.mxu2 %v1544_v22  ;;  %1036 = vmatpush.bf16.msrb.mxu3 %v1552_v23  ;;  %v180_v22 = vperm.slane %v178_v19, 0 }
  0xc2   :  { %900 = vmatpush.bf16.msrb.mxu0 %v1558_v6 }
  0xc3   :  { %912 = vmatpush.bf16.msrb.mxu1 %v1568_v63 }
  0xc5   :  { %1023 = vmatpush.bf16.msrb.mxu2 %v1543_v29  ;;  %1037 = vmatpush.bf16.msrb.mxu3 %v1551_v30 }
  0xc6   :  { %901 = vmatpush.bf16.msrb.mxu0 %v1557_v13 }
  0xc7   :  { %913 = vmatpush.bf16.msrb.mxu1 %v1567_v2 }
  0xc9   :  { %1024 = vmatpush.bf16.msrb.mxu2 %v1542_v37  ;;  %1038 = vmatpush.bf16.msrb.mxu3 %v1550_v38 }
  0xca   :  { %902 = vmatpush.bf16.msrb.mxu0 %v1556_v41 }
  0xcb   :  { %914 = vmatpush.bf16.msrb.mxu1 %v1566_v40 }
  0xcd   :  { %1025 = vmatpush.bf16.msrb.mxu2 %v1541_v45  ;;  %1039 = vmatpush.bf16.msrb.mxu3 %v1549_v46  ;;  %v1554_v45 = vld [vmem:[%s2074_s10 + $0x8] sm:$0xff]  ;;  %v1563_v46 = vld [vmem:[%s2074_s10 + $0x50] sm:$0xff] }
  0xce   :  { %903 = vmatpush.bf16.msrb.mxu0 %v1555_v43 }
  0xcf   :  { %915 = vmatpush.bf16.msrb.mxu1 %v1565_v42 }
  0xd1   :  { %1026 = vmatpush.bf16.msrb.mxu2 %v1540_v48  ;;  %1040 = vmatpush.bf16.msrb.mxu3 %v1548_v49  ;;  %v1562_v48 = vld [vmem:[%s2074_s10 + $0x48] sm:$0xff]  ;;  %v1561_v49 = vld [vmem:[%s2074_s10 + $0x40] sm:$0xff] }
  0xd2   :  { %904 = vmatpush.bf16.msrb.mxu0 %v1554_v45 }
  0xd3   :  { %916 = vmatpush.bf16.msrb.mxu1 %v1564_v44 }
  0xd5   :  { %1027 = vmatpush.bf16.msrb.mxu2 %v1539_v52  ;;  %1041 = vmatpush.bf16.msrb.mxu3 %v1547_v53 }
  0xd6   :  { %905 = vmatpush.bf16.msrb.mxu0 %v1553_v47 }
  0xd7   :  { %917 = vmatpush.bf16.msrb.mxu1 %v1563_v46 }
  0xd9   :  { %1028 = vmatpush.bf16.msrb.mxu2 %v1538_v54  ;;  %1042 = vmatpush.bf16.msrb.mxu3 %v1546_v55 }
  0xdb   :  { %918 = vmatpush.bf16.msrb.mxu1 %v1562_v48 }
  0xdd   :  { %1029 = vmatpush.bf16.msrb.mxu2 %v1537_v58  ;;  %1043 = vmatpush.bf16.msrb.mxu3 %v1545_v59 }
  0xdf   :  { %919 = vmatpush.bf16.msrb.mxu1 %v1561_v49 }
 0x11c   :  { %v381_v5 = vpop.f32.mrf.mxu0 }
 0x11d   :  { %v395_v14 = vpop.f32.mrf.mxu1  ;;  %v382_v28 = vadd.f32 %v381_v5, %v181_v24 }
 0x11f   :  { %v396_v33 = vadd.f32 %v395_v14, %v382_v28 }
 0x121   :  { %v401_v37 = vmax.f32 %v396_v33, 0.0 }
 0x122   :  { %v353_v50 = vpop.f32.mrf.mxu2 }
 0x123   :  { %v1977_v51 = vpop.f32.mrf.mxu3  ;;  %v354_v27 = vadd.f32 %v353_v50, %v180_v22  ;;  %v508_v50 = vld [vmem:[%s2072_s8] sm:$0x3] }
 0x124   :  { %v383_v23 = vpop.f32.mrf.mxu0  ;;  %v510_v52 = vperm.slane %v508_v50, 0 }
 0x125   :  { %v384_v26 = vadd.f32 %v383_v23, %v181_v24  ;;  %v397_v29 = vpop.f32.mrf.mxu1  ;;  %v368_v32 = vadd.f32 %v1977_v51, %v354_v27 }
 0x127   :  { %v398_v31 = vadd.f32 %v397_v29, %v384_v26  ;;  %v400_v36 = vmax.f32 %v368_v32, 0.0 }
 0x129   :  { %v403_v35 = vmax.f32 %v398_v31, 0.0 }
 0x12a   :  { %v355_v56 = vpop.f32.mrf.mxu2 }
 0x12b   :  { %v369_v57 = vpop.f32.mrf.mxu3  ;;  %v356_v25 = vadd.f32 %v355_v56, %v180_v22  ;;  %v735_v39 = vpack.c.bf16 %v403_v35, %v401_v37  ;;  %v511_v56 = vperm.slane %v508_v50, 1 }
 0x12d   :  { %v370_v30 = vadd.f32 %v369_v57, %v356_v25 }
 0x12f   :  { %v402_v34 = vmax.f32 %v370_v30, 0.0 }
 0x131   :  { %v734_v38 = vpack.c.bf16 %v402_v34, %v400_v36 }
 0x132   :  { %v451_v61 = vpop.f32.mrf.mxu2 }
 0x133   :  { %v465_v0 = vpop.f32.mrf.mxu3  ;;  %v452_v7 = vadd.f32 %v451_v61, %v409_v3 }
 0x134   :  { %v466_v8 = vadd.f32 %v465_v0, %v410_v4 }
 0x135   :  { %v470_v15 = vmax.f32 %v452_v7, 0.0 }
 0x136   :  { %v471_v17 = vmax.f32 %v466_v8, 0.0 }
 0x13a   :  { %v453_v9 = vpop.f32.mrf.mxu2 }
 0x13b   :  { %v454_v10 = vadd.f32 %v453_v9, %v409_v3  ;;  %v467_v11 = vpop.f32.mrf.mxu3 }
 0x13c   :  { %v468_v12 = vadd.f32 %v467_v11, %v410_v4 }
 0x13d   :  { %v472_v16 = vmax.f32 %v454_v10, 0.0 }
 0x13e   :  { %v473_v18 = vmax.f32 %v468_v12, 0.0 }
 0x13f   :  { %v474_v20 = vpack.c.bf16 %v472_v16, %v470_v15 }
 0x140   :  { %v475_v21 = vpack.c.bf16 %v473_v18, %v471_v17  ;;  %v1575_v17 = vld [vmem:[%s2075_s11] ss:$0 sm:$0xff] }
 0x141   :  { %682 = vmatmul.bf16.vlgmr.msra.gmra.mxu0 %v474_v20  ;;  %710 = vmatmul.bf16.vlgmr.msra.gmra.mxu2 %v474_v20 }
 0x142   :  { %696 = vmatmul.bf16.vlgmr.msra.gmra.mxu1 %v475_v21  ;;  %724 = vmatmul.bf16.vlgmr.msra.gmra.mxu3 %v475_v21 }
 0x151   :  { %1030 = vmatmul.bf16.vlgmr.msrb.gmra.mxu2 %v734_v38 }
 0x152   :  { %1044 = vmatmul.bf16.vlgmr.msrb.gmra.mxu3 %v735_v39 }
 0x1be   :  { %v683_v51 = vpop.f32.mrf.mxu0 }
 0x1bf   :  { %v697_v53 = vpop.f32.mrf.mxu1  ;;  %v684_v54 = vadd.f32 %v683_v51, %v510_v52 }
 0x1c1   :  { %v698_v59 = vadd.f32 %v697_v53, %v684_v54 }
 0x1c3   :  { %v730_v0 = vmax.f32 %v698_v59, 0.0 }
 0x1c4   :  { %v711_v55 = vpop.f32.mrf.mxu2 }
 0x1c5   :  { %v725_v57 = vpop.f32.mrf.mxu3  ;;  %v712_v62 = vadd.f32 %v711_v55, %v511_v56 }
 0x1c6   :  { %v685_v58 = vpop.f32.mrf.mxu0 }
 0x1c7   :  { %v686_v60 = vadd.f32 %v685_v58, %v510_v52  ;;  %v699_v61 = vpop.f32.mrf.mxu1  ;;  %v726_v3 = vadd.f32 %v725_v57, %v712_v62 }
 0x1c9   :  { %v700_v63 = vadd.f32 %v699_v61, %v686_v60  ;;  %v731_v8 = vmax.f32 %v726_v3, 0.0 }
 0x1cb   :  { %v732_v1 = vmax.f32 %v700_v63, 0.0 }
 0x1cc   :  { %v713_v2 = vpop.f32.mrf.mxu2 }
 0x1cd   :  { %v768_v4 = vpack.c.bf16 %v732_v1, %v730_v0  ;;  %v714_v5 = vadd.f32 %v713_v2, %v511_v56  ;;  %v727_v6 = vpop.f32.mrf.mxu3 }
 0x1cf   :  { %v728_v7 = vadd.f32 %v727_v6, %v714_v5  ;;  %906 = vmatmul.bf16.vlgmr.msrb.gmra.mxu0 %v768_v4 }
 0x1d1   :  { %v733_v9 = vmax.f32 %v728_v7, 0.0 }
 0x1d3   :  { %v769_v10 = vpack.c.bf16 %v733_v9, %v731_v8 }
 0x1d4   :  { %v1031_v12 = vpop.f32.mrf.mxu2 }
 0x1d5   :  { %920 = vmatmul.bf16.vlgmr.msrb.gmra.mxu1 %v769_v10  ;;  %v1045_v15 = vpop.f32.mrf.mxu3 }
 0x1dc   :  { %v1033_v23 = vpop.f32.mrf.mxu2 }
 0x1dd   :  { %v1047_v25 = vpop.f32.mrf.mxu3 }
 0x24c   :  { %v907_v11 = vpop.f32.mrf.mxu0 }
 0x252   :  { %v921_v13 = vpop.f32.mrf.mxu1 }
 0x253   :  { %v922_v14 = vadd.f32 %v921_v13, %v907_v11 }
 0x254   :  { %v909_v20 = vpop.f32.mrf.mxu0 }
 0x255   :  { %v1032_v16 = vadd.f32 %v1031_v12, %v922_v14 }
 0x257   :  { %v1046_v18 = vadd.f32 %v1045_v15, %v1032_v16 }
 0x259   :  { %v1054_v19 = vadd.f32 %v1575_v17, %v1046_v18 }
 0x25a   :  { %v923_v21 = vpop.f32.mrf.mxu1 }
 0x25b   :  { %1057 = vst.msk [vmem:[%s2076_s12] sm:$0xff] %vm1056_vm3, %v1054_v19  ;;  %v924_v22 = vadd.f32 %v923_v21, %v909_v20 }
 0x25d   :  { %v1034_v24 = vadd.f32 %v1033_v23, %v924_v22 }
 0x25f   :  { %v1048_v26 = vadd.f32 %v1047_v25, %v1034_v24 }
 0x261   :  { %v1055_v27 = vadd.f32 %v1575_v17, %v1048_v26 }
 0x263   :  { %1058 = vst.msk [vmem:[%s2076_s12 + $0x8] sm:$0xff] %vm1056_vm3, %v1055_v27 }
 0x264   :  { %1063 = vsyncpa [#allocation3], 1 }
 0x265   :  { %1064 = vsyncpa [#allocation5], 1 }

</bundles_post_ra>
